<compile_context>
chip_gen: v7x
topology: tpu7x:2x2x1
jax: 0.10.0
libtpu: 0.0.40
codegen_flags: <defaults>
</compile_context>

<pallas_src>
import jax
import jax.numpy as jnp
from jax.experimental import pallas as pl
from jax.experimental.pallas import tpu as pltpu

_SUB_CONST = 13.415


def _linear_sub_relu_kernel(x_ref, w_ref, b_ref, o_ref):
    # x_ref: SMEM (B, Din) scalars.
    # w_ref: VMEM (Din, Dout).
    # b_ref: VMEM (1, Dout) with the -13.415 constant already folded in.
    # o_ref: VMEM (B, Dout).
    B, Din = x_ref.shape
    for i in range(B):              # static unroll; B is tiny
        y = b_ref[...]              # fused (bias - 13.415)
        for k in range(Din):        # static unroll; Din == 3
            # SMEM scalar read -> splat-multiply against one weight row (VPU).
            y = y + x_ref[i, k] * w_ref[k:k + 1, :]
        o_ref[i:i + 1, :] = jnp.maximum(y, 0.0)   # ReLU + single store (f32)


def make_linear_sub_relu(w, b):
    """Build a fused y = relu(x @ w + b - 13.415) callable.

    Parameter prep (bias/constant fold) happens once here, not per call.
    w: (Din, Dout) f32 (i.e. W_torch.T), b: (Dout,) f32.
    Returned fn: x (B, Din) f32 -> (B, Dout) f32.
    """
    Din, Dout = w.shape
    w_dev = jnp.asarray(w, jnp.float32)
    b_eff = (jnp.asarray(b, jnp.float32) - _SUB_CONST).reshape(1, Dout)

    @jax.jit
    def fwd(x):
        B = x.shape[0]
        return pl.pallas_call(
            _linear_sub_relu_kernel,
            out_shape=jax.ShapeDtypeStruct((B, Dout), jnp.float32),
            in_specs=[
                pl.BlockSpec(memory_space=pltpu.MemorySpace.SMEM),   # x scalars
                pl.BlockSpec(memory_space=pltpu.MemorySpace.VMEM),   # weights
                pl.BlockSpec(memory_space=pltpu.MemorySpace.VMEM),   # folded bias
            ],
            out_specs=pl.BlockSpec(memory_space=pltpu.MemorySpace.VMEM),
            cost_estimate=pl.CostEstimate(
                flops=2 * B * Din * Dout,
                transcendentals=0,
                bytes_accessed=4 * (B * Din + Din * Dout + Dout + B * Dout),
            ),
        )(x.astype(jnp.float32), w_dev, b_eff)

    return fwd
    # TODO(synk): if this ever runs at large B/Din/Dout, switch to a 3-D
    # gridded MXU matmul: bf16 inputs + f32 VMEM accumulator,
    # ("parallel","parallel","arbitrary") semantics; 256-multiple tiles on
    # v6e, 128-multiple tiles (f32 epilogue) on v5e, and on v7x keep
    # 2 buffers x (tm*tk + tk*tn + tm*tn) x 4B under the 32 MiB scoped-VMEM
    # default (64 MiB physical).


if __name__ == "__main__":
    key = jax.random.PRNGKey(0)
    kx, kw, kb = jax.random.split(key, 3)

    in_features = 3
    out_features = 3   # nn.Linear(in_features=3) interpreted as Linear(3, 3)
    batch = 1

    # Deterministic init mimicking nn.Linear's U(-1/sqrt(fan_in), 1/sqrt(fan_in)).
    bound = 1.0 / (in_features ** 0.5)
    w = jax.random.uniform(kw, (in_features, out_features), jnp.float32, -bound, bound)
    b = jax.random.uniform(kb, (out_features,), jnp.float32, -bound, bound)

    # Input analogous to torch.randn(1, 3).
    x = jax.random.normal(kx, (batch, in_features), jnp.float32)

    linear_sub_relu = make_linear_sub_relu(w, b)   # one-time param prep

    out = linear_sub_relu(x)
    jax.block_until_ready(out)
    ref = jnp.maximum(x @ w + b - _SUB_CONST, 0.0)
    assert out.shape == (batch, out_features)
    assert jnp.allclose(out, ref, atol=1e-5, rtol=1e-5), (out, ref)

    # Non-degenerate check: with randn input, relu(x@w+b-13.415) is ~always 0,
    # which would not catch a wrong matmul.  Use a large input aligned with
    # w[:, 0] so at least one output clears the 13.415 threshold.
    x_big = (1000.0 * w[:, 0]).reshape(1, in_features)
    out_big = linear_sub_relu(x_big)
    jax.block_until_ready(out_big)
    ref_big = jnp.maximum(x_big @ w + b - _SUB_CONST, 0.0)
    assert float(jnp.max(ref_big)) > 0.0, "check input is degenerate"
    assert jnp.allclose(out_big, ref_big, atol=1e-4, rtol=1e-4), (out_big, ref_big)

    print("KERNEL_OK")
</pallas_src>

<mosaic_0001>
module attributes {stable_mosaic.version = 11 : i64} {
  func.func @_linear_sub_relu_kernel(%arg0: memref<1x3xf32, #tpu.memory_space<smem>>, %arg1: memref<3x3xf32, #tpu.memory_space<vmem>>, %arg2: memref<1x3xf32, #tpu.memory_space<vmem>>, %arg3: memref<1x3xf32, #tpu.memory_space<vmem>>) attributes {dimension_semantics = [], scalar_prefetch = 0 : i64, scratch_operands = 0 : i64, tpu.core_type = #tpu.core_type<tc>} {
    %c0 = arith.constant 0 : index
    %c0_0 = arith.constant 0 : index
    %0 = vector.load %arg2[%c0, %c0_0] : memref<1x3xf32, #tpu.memory_space<vmem>>, vector<1x3xf32>
    %c0_1 = arith.constant 0 : index
    %c0_2 = arith.constant 0 : index
    %1 = memref.load %arg0[%c0_1, %c0_2] : memref<1x3xf32, #tpu.memory_space<smem>>
    %c0_3 = arith.constant 0 : index
    %c0_4 = arith.constant 0 : index
    %2 = vector.load %arg1[%c0_3, %c0_4] : memref<3x3xf32, #tpu.memory_space<vmem>>, vector<1x3xf32>
    %3 = vector.broadcast %1 : f32 to vector<1x3xf32>
    %4 = arith.mulf %3, %2 : vector<1x3xf32>
    %5 = arith.addf %0, %4 : vector<1x3xf32>
    %c0_5 = arith.constant 0 : index
    %c1 = arith.constant 1 : index
    %6 = memref.load %arg0[%c0_5, %c1] : memref<1x3xf32, #tpu.memory_space<smem>>
    %c1_6 = arith.constant 1 : index
    %c0_7 = arith.constant 0 : index
    %7 = vector.load %arg1[%c1_6, %c0_7] : memref<3x3xf32, #tpu.memory_space<vmem>>, vector<1x3xf32>
    %8 = vector.broadcast %6 : f32 to vector<1x3xf32>
    %9 = arith.mulf %8, %7 : vector<1x3xf32>
    %10 = arith.addf %5, %9 : vector<1x3xf32>
    %c0_8 = arith.constant 0 : index
    %c2 = arith.constant 2 : index
    %11 = memref.load %arg0[%c0_8, %c2] : memref<1x3xf32, #tpu.memory_space<smem>>
    %c2_9 = arith.constant 2 : index
    %c0_10 = arith.constant 0 : index
    %12 = vector.load %arg1[%c2_9, %c0_10] : memref<3x3xf32, #tpu.memory_space<vmem>>, vector<1x3xf32>
    %13 = vector.broadcast %11 : f32 to vector<1x3xf32>
    %14 = arith.mulf %13, %12 : vector<1x3xf32>
    %15 = arith.addf %10, %14 : vector<1x3xf32>
    %cst = arith.constant 0.000000e+00 : f32
    %16 = vector.broadcast %cst : f32 to vector<1x3xf32>
    %17 = arith.maximumf %15, %16 : vector<1x3xf32>
    %c0_11 = arith.constant 0 : index
    %c0_12 = arith.constant 0 : index
    %18 = vector.load %arg3[%c0_11, %c0_12] : memref<1x3xf32, #tpu.memory_space<vmem>>, vector<1x3xf32>
    tpu.vector_store %arg3[%c0_11, %c0_12], %17 {strides = array<i32>} : memref<1x3xf32, #tpu.memory_space<vmem>>, vector<1x3xf32>,
    return
  }
}

</mosaic_0001>

<bundles_post_ra>
// kernel: fwd.1
= control target key start
LH: loop header
LB: loop body
LE: loop exit
PB: predicated region body
PF: predicated region fallthrough
CT: control target
= control target key end

     0   :  { %8 = vsyncpa [#allocation5], 0  ;;  %s200_s0 = inlined_call_operand.hbm [shape: f32[1,3], index: 0, kind: input, shape index: {}]   ;;  %s201_s1 = inlined_call_operand.hbm [shape: f32[3,3], index: 1, kind: input, shape index: {}]   ;;  %s202_s2 = inlined_call_operand.vmem [shape: f32[1,3], index: 2, kind: input, shape index: {}]   ;;  %s203_s3 = inlined_call_operand.hbm [shape: f32[1,3], index: 3, kind: output, shape index: {}]  }
   0x1   :  { %9 = vsyncpa [#allocation3], 0 }
   0x2   :  { %10 = vsyncpa [#allocation4], 0  ;;  %s78_s14 = scalar_lea.hbm %s200_s0, 16 }
   0x3   :  { %p79_p0 = scmp.ne.s32.totalorder %s200_s0, %s78_s14  ;;  %p82_p1 = scmp.lt.u32.totalorder %s78_s14, %s200_s0 }
   0x5   :  { %p84_p2 = pnand %p82_p1, %p79_p0 }
   0x7   :  { %87 = shalt.err (!%p84_p2)
}
   0x8   :  { %s138_s19 = smov [#allocation2]   ;;  %s139_s22 = smov [#allocation6]  }
   0x9   :  { %18 = dma.hbm_to_smem %s200_s0, 16, %s138_s19, [#allocation5]  }
   0xa   :  { %s25_s23 = sshll.u32 %s139_s22, 4  ;;  %s88_s26 = scalar_lea.hbm %s201_s1, 64  ;;  %s26_s23 = int_to_ptr.vmem [resolvable:$true] %s25_s23 }
   0xb   :  { %p89_p3 = scmp.ne.s32.totalorder %s201_s1, %s88_s26  ;;  %p92_p4 = scmp.lt.u32.totalorder %s88_s26, %s201_s1 }
   0xd   :  { %p94_p5 = pnand %p92_p4, %p89_p3 }
   0xf   :  { %97 = shalt.err (!%p94_p5)
}
  0x10   :  { %s98_s4 = scalar_lea.vmem %s26_s23, 64  ;;  %p103_p7 = scmp.lt.s32.totalorder %s26_s23, %s26_s23 }
  0x11   :  { %p99_p6 = scmp.ne.s32.totalorder %s26_s23, %s98_s4  ;;  %p104_p8 = scmp.lt.s32.totalorder %s98_s4, %s98_s4 }
  0x13   :  { %p105_p9 = por %p104_p8, %p103_p7 }
  0x15   :  { %p106_p10 = pnand %p105_p9, %p99_p6 }
  0x17   :  { %109 = shalt.err (!%p106_p10)
}
  0x18   :  { %28 = dma.hbm_to_vmem [thread:$0]  %s201_s1, 64, %s26_s23, [#allocation3]  }
  0x19   :  { %132 = dma.done.wait [#allocation5], 16  }
  0x1a   :  { %133 = vsyncadd [#allocation5], 4294967280 }
  0x1b   :  { %134 = dma.done.wait [#allocation3], 64  }
  0x1c   :  { %135 = vsyncadd [#allocation3], 4294967232 }
  0x1d   :  { %37 = sfence }
  0x1e   :  { %s39_s6 = sld [smem:[#allocation2]]  ;;  %s73_s7 = sld [smem:[#allocation2 + $0x1]]  ;;  %v40_v0 = vld [vmem:[#allocation6] sm:$0x1]  ;;  %v45_v1 = vld [vmem:[#allocation6 + $0x1] sm:$0x1] }
  0x1f   :  { %s74_s8 = sld [smem:[#allocation2 + $0x2]]  ;;  %v38_v2 = vld [vmem:[%s202_s2] sm:$0x1]  ;;  %v50_v4 = vld [vmem:[#allocation6 + $0x2] sm:$0x1]  ;;  %s140_s1 = smov [#allocation7]  }
  0x20   :  { %s63_s11 = sshll.u32 %s140_s1, 4  ;;  %vm55_vm0 = vcmask 16384   ;;  %s64_s11 = int_to_ptr.vmem [resolvable:$true] %s63_s11 }
  0x21   :  { %s110_s12 = scalar_lea.vmem %s64_s11, 16  ;;  %s114_s13 = scalar_lea.vmem %s64_s11, 32 }
  0x22   :  { %p111_p11 = scmp.ne.s32.totalorder %s64_s11, %s110_s12  ;;  %p115_p12 = scmp.lt.s32.totalorder %s64_s11, %s64_s11 }
  0x23   :  { %p116_p13 = scmp.lt.s32.totalorder %s114_s13, %s110_s12 }
  0x24   :  { %v41_v3 = vstv %s39_s6  ;;  %v46_v6 = vstv %s73_s7 }
  0x25   :  { %v42_v5 = vmul.f32 %v41_v3, %v40_v0  ;;  %v51_v7 = vstv %s74_s8  ;;  %v47_v8 = vmul.f32 %v46_v6, %v45_v1  ;;  %p117_p0 = por %p116_p13, %p115_p12 }
  0x26   :  { %v52_v10 = vmul.f32 %v51_v7, %v50_v4 }
  0x27   :  { %v43_v9 = vadd.f32 %v42_v5, %v38_v2  ;;  %p118_p1 = pnand %p117_p0, %p111_p11 }
  0x29   :  { %v48_v11 = vadd.f32 %v47_v8, %v43_v9 }
  0x2b   :  { %v53_v12 = vadd.f32 %v52_v10, %v48_v11 }
  0x2d   :  { %v54_v13 = vmax.f32 %v53_v12, 0.0 }
  0x2f   :  { %56 = vst.msk [vmem:[#allocation7] sm:$0x1] %vm55_vm0, %v54_v13 }
  0x30   :  { %121 = shalt.err (!%p118_p1)
}
  0x31   :  { %s122_s15 = scalar_lea.hbm %s203_s3, 16 }
  0x32   :  { %p123_p2 = scmp.ne.s32.totalorder %s203_s3, %s122_s15  ;;  %p126_p3 = scmp.lt.u32.totalorder %s122_s15, %s203_s3 }
  0x34   :  { %p128_p4 = pnand %p126_p3, %p123_p2 }
  0x36   :  { %131 = shalt.err (!%p128_p4)
}
  0x37   :  { %66 = dma.vmem_to_hbm [thread:$0]  %s64_s11, 16, %s203_s3, [#allocation4]  }
  0x38   :  { %136 = dma.done.wait [#allocation4], 16  }
  0x39   :  { %137 = vsyncadd [#allocation4], 4294967280 }
  0x3a   :  { %70 = vsyncpa [#allocation3], 1 }
  0x3b   :  { %71 = vsyncpa [#allocation4], 1 }
  0x3c   :  { %72 = vsyncpa [#allocation5], 1 }

</bundles_post_ra>
